<compile_context>
chip_gen: v7x
topology: tpu7x:2x2x1
jax: 0.10.0
libtpu: 0.0.40
codegen_flags: <defaults>
</compile_context>

<pallas_src>
import math

import jax
import jax.numpy as jnp
from jax.experimental import pallas as pl
from jax.experimental.pallas import tpu as pltpu

_LANE = 128


def _ew_product_kernel(x_ref, w_ref, o_ref):
    # x_ref: (tile_rows, tile_lane), w_ref: (1, tile_lane) -> broadcast multiply.
    o_ref[...] = (x_ref[...] * w_ref[...]).astype(o_ref.dtype)


def _round_up(n, m):
    return ((n + m - 1) // m) * m


def _cdiv(a, b):
    return (a + b - 1) // b


def _generation_budgets():
    """(block_bytes, vmem_limit_bytes) tuned per TPU generation."""
    try:
        kind = jax.devices()[0].device_kind.lower()
    except Exception:
        kind = ""
    if "v5 lite" in kind or "v5e" in kind or "v5litepod" in kind:
        # 0.82 TB/s HBM: 3 MiB tiles already amortize the ~0.35us step cost;
        # raise the scoped limit past v5e's 16 MiB default for the 4 buffers.
        return 3 << 20, 24 << 20
    if "v6" in kind:
        # 1.4 TB/s HBM, 128 MiB physical VMEM: 6 MiB tiles (~24 MiB live).
        return 6 << 20, 40 << 20
    if "v7" in kind:
        # 3.2 TB/s HBM but only 64 MiB per-TC VMEM: big tiles, capped limit.
        return 8 << 20, 44 << 20
    # Unknown / older generations: moderate, safe defaults.
    return 4 << 20, 32 << 20


def elementwise_product(x, weights, *, block_bytes=None, vmem_limit_bytes=None,
                        min_bytes_for_kernel=256 << 10, min_grid_steps=4):
    """x: any shape (..., input_size); weights: (input_size,)."""
    input_size = weights.shape[0]
    assert x.shape[-1] == input_size, "last dim of x must equal input_size"

    orig_shape = x.shape
    out_dtype = x.dtype
    # Math in x's dtype (module has f32 x and f32 weights, so this matches).
    # TODO(synk): for bf16 x + f32 weights, compute in f32 and cast the product
    # if promote-to-f32 semantics are ever required.
    w = weights.astype(out_dtype)

    dtype_bytes = jnp.dtype(out_dtype).itemsize
    n_elems = x.size
    total_bytes = n_elems * dtype_bytes

    # Tiny inputs: pallas_call launch + DMA setup dominates; plain XLA wins.
    if total_bytes < min_bytes_for_kernel:
        return x * w

    if block_bytes is None or vmem_limit_bytes is None:
        auto_block, auto_limit = _generation_budgets()
        block_bytes = auto_block if block_bytes is None else block_bytes
        vmem_limit_bytes = auto_limit if vmem_limit_bytes is None else vmem_limit_bytes

    # Sublane tile for this dtype: 8 rows (f32), 16 (bf16), 32 (int8/fp8).
    sublane = max(8, 32 // dtype_bytes)

    # --- pick a lane-dense 2-D layout (rows, lane) --------------------------
    if input_size % _LANE == 0:
        lane = input_size
        w_row = w.reshape(1, lane)
    else:
        # Repack the flattened array into lcm(input_size, 128)-wide rows so
        # output stores are unmasked and lanes fully utilized (e.g. 96 -> 384).
        # Lane c then maps to feature c % input_size -> tiled weights.
        lane_dense = input_size * _LANE // math.gcd(input_size, _LANE)
        if n_elems % lane_dense == 0:
            lane = lane_dense
            w_row = jnp.tile(w, lane // input_size).reshape(1, lane)
        else:
            # TODO(synk): tail-peel / pad so odd leading-dim products also hit
            # the unmasked lane-dense path; keep the natural layout for now.
            lane = input_size
            w_row = w.reshape(1, lane)

    x2d = x.reshape(-1, lane)
    rows = x2d.shape[0]

    # --- lane-axis tile (bounds VMEM for very wide feature dims) ------------
    if lane % _LANE == 0:
        max_lane = max(_LANE,
                       (block_bytes // (sublane * dtype_bytes)) // _LANE * _LANE)
        tile_lane = min(lane, max_lane)
    else:
        tile_lane = lane  # masked fallback: last dim must equal full extent

    # Safety: a non-tileable, very wide lane would blow VMEM -> plain XLA.
    if 4 * sublane * tile_lane * dtype_bytes > vmem_limit_bytes:
        return x * w

    lane_steps = _cdiv(lane, tile_lane)

    # --- VMEM-budgeted row tile ---------------------------------------------
    if rows <= sublane:
        tile_rows = rows                      # single full-extent block
    else:
        tile_rows = max(sublane,
                        (block_bytes // (tile_lane * dtype_bytes))
                        // sublane * sublane)
        # Guarantee >= min_grid_steps total steps so each v7x TensorCore still
        # double-buffers (>= 2 steps/core); cheap (~0.35us/step) on v5e/v6e.
        min_row_steps = _cdiv(min_grid_steps, lane_steps)
        if min_row_steps > 1:
            tile_rows = min(tile_rows,
                            _round_up(_cdiv(rows, min_row_steps), sublane))
        tile_rows = min(tile_rows, _round_up(rows, sublane))

    grid = (_cdiv(rows, tile_rows), lane_steps)

    cost = pl.CostEstimate(flops=n_elems, transcendentals=0,
                           bytes_accessed=2 * total_bytes + lane * dtype_bytes)

    out2d = pl.pallas_call(
        _ew_product_kernel,
        out_shape=jax.ShapeDtypeStruct((rows, lane), out_dtype),
        grid_spec=pltpu.PrefetchScalarGridSpec(
            num_scalar_prefetch=0,
            grid=grid,
            in_specs=[
                pl.BlockSpec((tile_rows, tile_lane), lambda i, j: (i, j)),
                # Row-constant block index -> weights stay resident in VMEM.
                pl.BlockSpec((1, tile_lane), lambda i, j: (0, j)),
            ],
            out_specs=pl.BlockSpec((tile_rows, tile_lane), lambda i, j: (i, j)),
        ),
        compiler_params=pltpu.CompilerParams(
            dimension_semantics=("parallel", "parallel"),
            vmem_limit_bytes=vmem_limit_bytes,
        ),
        cost_estimate=cost,
    )(x2d, w_row)

    return out2d.reshape(orig_shape)


if __name__ == "__main__":
    key = jax.random.PRNGKey(0)
    k1, k2, k3, k4, k5 = jax.random.split(key, 5)

    checks = []

    # 1) Module-sized demo (batch=2, seq=8, hidden=32): lane-dense repack
    #    (32 -> 128 lanes). Forced onto the kernel path.
    input_size = 32
    x1 = jax.random.normal(k1, (2, 8, input_size), dtype=jnp.float32)
    w1 = jnp.ones((input_size,), dtype=jnp.float32)   # matches torch.ones init
    checks.append((elementwise_product(x1, w1, min_bytes_for_kernel=0),
                   x1 * w1, 1e-6))

    # 2) Tiled path: lane-dense feature size (multiple of 128), multi-step grid.
    x2 = jax.random.normal(k2, (8, 128, 256), dtype=jnp.float32)
    w2 = jax.random.normal(jax.random.PRNGKey(1), (256,), dtype=jnp.float32)
    checks.append((elementwise_product(x2, w2), x2 * w2, 1e-6))

    # 3) Awkward feature size (96): lcm repack path (96 -> 384 lanes).
    x3 = jax.random.normal(k3, (2, 16, 96), dtype=jnp.float32)
    w3 = jax.random.normal(jax.random.PRNGKey(2), (96,), dtype=jnp.float32)
    checks.append((elementwise_product(x3, w3, min_bytes_for_kernel=0),
                   x3 * w3, 1e-6))

    # 4) bf16: exercises dtype-aware (16-row) sublane rounding.
    x4 = jax.random.normal(k4, (4, 64, 128), dtype=jnp.bfloat16)
    w4 = jax.random.normal(jax.random.PRNGKey(3), (128,), dtype=jnp.bfloat16)
    checks.append((elementwise_product(x4, w4, min_bytes_for_kernel=0),
                   x4 * w4, 1e-2))

    # 5) Odd leading-dim product with sub-128 feature: masked-layout fallback.
    x5 = jax.random.normal(k5, (3, 96), dtype=jnp.float32)
    w5 = jax.random.normal(jax.random.PRNGKey(4), (96,), dtype=jnp.float32)
    checks.append((elementwise_product(x5, w5, min_bytes_for_kernel=0),
                   x5 * w5, 1e-6))

    for y, ref, tol in checks:
        y = jax.block_until_ready(y)
        assert y.shape == ref.shape and y.dtype == ref.dtype
        assert jnp.allclose(y.astype(jnp.float32), ref.astype(jnp.float32),
                            atol=tol, rtol=tol), "mismatch vs reference"

    print("KERNEL_OK")
</pallas_src>

<mosaic_0001>
module attributes {stable_mosaic.version = 11 : i64} {
  func.func @_ew_product_kernel(%arg0: i32, %arg1: i32, %arg2: memref<4x128xf32, #tpu.memory_space<vmem>>, %arg3: memref<1x128xf32, #tpu.memory_space<vmem>>, %arg4: memref<4x128xf32, #tpu.memory_space<vmem>>) attributes {dimension_semantics = [#tpu.dimension_semantics<parallel>, #tpu.dimension_semantics<parallel>], iteration_bounds = array<i64: 1, 1>, scalar_prefetch = 0 : i64, scratch_operands = 0 : i64, tpu.core_type = #tpu.core_type<tc>, window_params = [{transform_indices = @transform_0, window_bounds = array<i64: 4, 128>}, {transform_indices = @transform_1, window_bounds = array<i64: 1, 128>}, {transform_indices = @transform_2, window_bounds = array<i64: 4, 128>}]} {
    %c0 = arith.constant 0 : index
    %c0_0 = arith.constant 0 : index
    %0 = vector.load %arg2[%c0, %c0_0] : memref<4x128xf32, #tpu.memory_space<vmem>>, vector<4x128xf32>
    %c0_1 = arith.constant 0 : index
    %c0_2 = arith.constant 0 : index
    %1 = vector.load %arg3[%c0_1, %c0_2] : memref<1x128xf32, #tpu.memory_space<vmem>>, vector<1x128xf32>
    %2 = vector.broadcast %1 : vector<1x128xf32> to vector<4x128xf32>
    %3 = arith.mulf %0, %2 : vector<4x128xf32>
    %c0_3 = arith.constant 0 : index
    %c0_4 = arith.constant 0 : index
    %4 = vector.load %arg4[%c0_3, %c0_4] : memref<4x128xf32, #tpu.memory_space<vmem>>, vector<4x128xf32>
    tpu.vector_store %arg4[%c0_3, %c0_4], %3 {strides = array<i32>} : memref<4x128xf32, #tpu.memory_space<vmem>>, vector<4x128xf32>,
    return
  }
  func.func @transform_0(%arg0: i32, %arg1: i32) -> (i32, i32) {
    %c0_i32 = arith.constant 0 : i32
    return %arg0, %arg1 : i32, i32
  }
  func.func @transform_1(%arg0: i32, %arg1: i32) -> (i32, i32) {
    %c0_i32 = arith.constant 0 : i32
    %c0_i32_0 = arith.constant 0 : i32
    return %c0_i32, %arg1 : i32, i32
  }
  func.func @transform_2(%arg0: i32, %arg1: i32) -> (i32, i32) {
    %c0_i32 = arith.constant 0 : i32
    return %arg0, %arg1 : i32, i32
  }
}

</mosaic_0001>

<bundles_post_ra>
// kernel: tpu_custom_call.1
= control target key start
LH: loop header
LB: loop body
LE: loop exit
PB: predicated region body
PF: predicated region fallthrough
CT: control target
= control target key end

     0   :  { %7 = vsyncpa [#allocation3], 0  ;;  %s144_s0 = inlined_call_operand.hbm [shape: f32[4,128], index: 0, kind: input, shape index: {}]   ;;  %s145_s1 = inlined_call_operand.vmem [shape: f32[1,128], index: 1, kind: input, shape index: {}]   ;;  %s146_s2 = inlined_call_operand.hbm [shape: f32[4,128], index: 2, kind: output, shape index: {}]  }
   0x1   :  { %8 = vsyncpa [#allocation4], 0  ;;  %s100_s9 = smov [#allocation2]   ;;  %s52_s13 = scalar_lea.hbm %s144_s0, 64 }
   0x2   :  { %s15_s10 = sshll.u32 %s100_s9, 4  ;;  %p53_p0 = scmp.ne.s32.totalorder %s144_s0, %s52_s13  ;;  %s16_s10 = int_to_ptr.vmem [resolvable:$true] %s15_s10 }
   0x3   :  { %p56_p1 = scmp.lt.u32.totalorder %s52_s13, %s144_s0 }
   0x5   :  { %p58_p2 = pnand %p56_p1, %p53_p0 }
   0x7   :  { %61 = shalt.err (!%p58_p2)
}
   0x8   :  { %s62_s18 = scalar_lea.vmem %s16_s10, 64  ;;  %p67_p4 = scmp.lt.s32.totalorder %s16_s10, %s16_s10 }
   0x9   :  { %p63_p3 = scmp.ne.s32.totalorder %s16_s10, %s62_s18  ;;  %p68_p5 = scmp.lt.s32.totalorder %s62_s18, %s62_s18 }
   0xb   :  { %p69_p6 = por %p68_p5, %p67_p4 }
   0xd   :  { %p70_p7 = pnand %p69_p6, %p63_p3 }
   0xf   :  { %73 = shalt.err (!%p70_p7)
}
  0x10   :  { %18 = dma.hbm_to_vmem [thread:$0]  %s144_s0, 64, %s16_s10, [#allocation3]  }
  0x11   :  { %96 = dma.done.wait [#allocation3], 64  }
  0x12   :  { %97 = vsyncadd [#allocation3], 4294967232  ;;  %s101_s21 = smov [#allocation5]   ;;  %v24_v0 = vld [vmem:[#allocation2] sm:$0xf] }
  0x13   :  { %s40_s22 = sshll.u32 %s101_s21, 4  ;;  %v49_v1 = vld [vmem:[%s145_s1] ss:$0 sm:$0xff]  ;;  %s41_s22 = int_to_ptr.vmem [resolvable:$true] %s40_s22 }
  0x14   :  { %v32_v2 = vmul.f32 %v49_v1, %v24_v0  ;;  %s74_s25 = scalar_lea.vmem %s41_s22, 64  ;;  %p79_p9 = scmp.lt.s32.totalorder %s41_s22, %s41_s22 }
  0x15   :  { %p75_p8 = scmp.ne.s32.totalorder %s41_s22, %s74_s25  ;;  %p80_p10 = scmp.lt.s32.totalorder %s74_s25, %s74_s25 }
  0x16   :  { %33 = vst [vmem:[#allocation5] sm:$0xf] %v32_v2 }
  0x17   :  { %p81_p11 = por %p80_p10, %p79_p9 }
  0x19   :  { %p82_p12 = pnand %p81_p11, %p75_p8 }
  0x1b   :  { %85 = shalt.err (!%p82_p12)
}
  0x1c   :  { %s86_s27 = scalar_lea.hbm %s146_s2, 64 }
  0x1d   :  { %p87_p13 = scmp.ne.s32.totalorder %s146_s2, %s86_s27  ;;  %p90_p0 = scmp.lt.u32.totalorder %s86_s27, %s146_s2 }
  0x1f   :  { %p92_p1 = pnand %p90_p0, %p87_p13 }
  0x21   :  { %95 = shalt.err (!%p92_p1)
}
  0x22   :  { %43 = dma.vmem_to_hbm [thread:$0]  %s41_s22, 64, %s146_s2, [#allocation4]  }
  0x23   :  { %98 = dma.done.wait [#allocation4], 64  }
  0x24   :  { %99 = vsyncadd [#allocation4], 4294967232 }
  0x25   :  { %47 = vsyncpa [#allocation3], 1 }
  0x26   :  { %48 = vsyncpa [#allocation4], 1 }

</bundles_post_ra>
